<compile_context>
chip_gen: v5e
topology: v5e:2x2
jax: 0.10.0
libtpu: 0.0.40
codegen_flags: <defaults>
</compile_context>

<pallas_src>
import functools

import jax
import jax.numpy as jnp
from jax.experimental import pallas as pl
from jax.experimental.pallas import tpu as pltpu


def _si_kl_kernel(x_ref, w_ref, b_ref, y_ref, out_ref, *,
                  cp, tile_b, tiles_per_split, batch_size):
    c = pl.program_id(0)          # core-split index ("parallel")
    i = pl.program_id(1)          # batch-tile index ("arbitrary" reduction)

    # The (8, cp) output block is resident across the reduction axis and acts
    # as the accumulator; zero it at the first tile of each split.
    @pl.when(i == 0)
    def _init():
        out_ref[...] = jnp.zeros_like(out_ref)

    # One fused MXU matmul for both heads: f32 stream cast to bf16 in-register,
    # f32 accumulation.  The bias stays f32 (padded classes carry -1e30, which
    # would saturate to -inf in bf16 and poison the log-softmax).
    xb = x_ref[...].astype(jnp.bfloat16)
    logits = jnp.dot(xb, w_ref[...],
                     preferred_element_type=jnp.float32) + b_ref[...]
    logits1 = logits[:, :cp]      # h1 logits (padded classes biased to -1e30)
    logits2 = logits[:, cp:]      # h2 logits

    col = jax.lax.broadcasted_iota(jnp.int32, (tile_b, cp), 1)
    y = y_ref[...]                                   # (tile_b, 1) int32
    label_mask = col == y                            # (tile_b, cp)

    # Rows that exist in the (unpadded) batch.  The logical row index uses the
    # unclamped tile position, so both the ragged tail of the last tile and
    # any redundant (clamped) tiles contribute exactly zero.
    row0 = (c * tiles_per_split + i) * tile_b
    row = row0 + jax.lax.broadcasted_iota(jnp.int32, (tile_b, 1), 0)
    valid = row < batch_size                         # (tile_b, 1)

    # --- base loss: kl_div(log_softmax(h2), one_hot(y), 'batchmean') -------
    # one-hot target => per-row term is -log_softmax2[i, y_i]
    #                 = logsumexp(logits2_i) - logits2[i, y_i].
    m2 = jnp.max(logits2, axis=-1, keepdims=True)
    lse2 = m2 + jnp.log(jnp.sum(jnp.exp(logits2 - m2), axis=-1, keepdims=True))
    logit2_lab = jnp.sum(jnp.where(label_mask, logits2, 0.0),
                         axis=-1, keepdims=True)
    base_per_row = jnp.where(valid, lse2 - logit2_lab, 0.0)     # (tile_b, 1)

    # --- h1-correct count (gates the support / dissonance branch) ----------
    # "label logit is the row max"  <=>  label is in the argmax set.  (Tie-
    # break differs from torch.argmax's first-index rule, but this count only
    # gates a term that is identically zero, so the loss is unaffected.)
    m1 = jnp.max(logits1, axis=-1, keepdims=True)
    logit1_lab = jnp.sum(jnp.where(label_mask, logits1, 0.0),
                         axis=-1, keepdims=True)
    h1_correct = (logit1_lab >= m1) & valid
    corr_per_row = jnp.where(h1_correct, 1.0, 0.0)              # (tile_b, 1)

    base_sum = jnp.sum(base_per_row)    # scalar partial sums for this tile
    corr_sum = jnp.sum(corr_per_row)

    # Accumulate into sublane 0 / 1, lane 0 of the resident output block.
    sub = jax.lax.broadcasted_iota(jnp.int32, (8, cp), 0)
    lane = jax.lax.broadcasted_iota(jnp.int32, (8, cp), 1)
    contrib = (jnp.where((sub == 0) & (lane == 0), base_sum, 0.0)
               + jnp.where((sub == 1) & (lane == 0), corr_sum, 0.0))
    out_ref[...] += contrib


def strict_imitation_kl_loss(x, y, w1, b1, w2, b2, *, lambda_c, num_classes,
                             tile_b=512, num_splits=1):
    """Tiled Pallas forward pass of StrictImitationKLDivergenceLoss.

    num_splits: number of TensorCore shards for the leading 'parallel' grid
    axis (1 on v5e/v6e, 2 on v7x).  tile_b: batch rows per grid step
    (~512 on v6e/v7x, 128-256 on v5e).
    """
    B, D = x.shape
    C = num_classes
    cp = ((C + 127) // 128) * 128          # lane-pad each head's class dim
    tile_b = min(tile_b, ((B + 7) // 8) * 8)
    assert tile_b % 8 == 0, "tile_b must be a multiple of 8"

    total_tiles = -(-B // tile_b)
    tiles_per_split = -(-total_tiles // num_splits)
    last_block = total_tiles - 1

    # x streams through unpadded / uncast (no extra HBM round trip); labels
    # are int32 (no one-hot traffic).
    yb = y.astype(jnp.int32).reshape(-1, 1)

    # Fused, lane-padded two-head weight matrix and bias.  Bias must stay
    # float32: -1e30 on padded classes -> ~0 probability after softmax.
    w = jnp.zeros((D, 2 * cp), jnp.float32)
    w = w.at[:, :C].set(w1).at[:, cp:cp + C].set(w2)
    w = w.astype(jnp.bfloat16)
    b = jnp.full((1, 2 * cp), -1e30, jnp.float32)
    b = b.at[0, :C].set(b1).at[0, cp:cp + C].set(b2)

    kernel = functools.partial(_si_kl_kernel, cp=cp, tile_b=tile_b,
                               tiles_per_split=tiles_per_split, batch_size=B)

    # Clamp the block index so uneven split/tile counts never issue a fully
    # out-of-bounds DMA; the in-kernel `valid` mask (computed from the
    # *unclamped* row index) zeroes any redundant tile's contribution.
    def stream_map(c, i):
        return (jnp.minimum(c * tiles_per_split + i, last_block), 0)

    # VMEM budget from actual usage: double-buffered x/y stream,
    # single-buffered w/b, accumulator block, f32 temporaries headroom.
    # Clamped so it stays safe under v7x's 64 MiB physical VMEM.
    est = (2 * tile_b * (D * x.dtype.itemsize + 4)      # x + y, double-buffered
           + D * 2 * cp * 2 + 2 * cp * 4                # bf16 w + f32 b
           + num_splits * 8 * cp * 4                    # output accumulator
           + 10 * tile_b * 2 * cp * 4)                  # f32 temporaries
    vmem_limit = int(min(max(2 * est, 16 << 20), 48 << 20))

    out = pl.pallas_call(
        kernel,
        out_shape=jax.ShapeDtypeStruct((num_splits * 8, cp), jnp.float32),
        grid_spec=pltpu.PrefetchScalarGridSpec(
            num_scalar_prefetch=0,
            grid=(num_splits, tiles_per_split),
            in_specs=[
                pl.BlockSpec((tile_b, D), stream_map),
                # Constant-index (resident) operands: single-buffered.
                pl.BlockSpec((D, 2 * cp), lambda c, i: (0, 0),
                             pipeline_mode=pl.Buffered(1)),
                pl.BlockSpec((1, 2 * cp), lambda c, i: (0, 0),
                             pipeline_mode=pl.Buffered(1)),
                pl.BlockSpec((tile_b, 1), stream_map),
            ],
            out_specs=pl.BlockSpec((8, cp), lambda c, i: (c, 0)),
        ),
        compiler_params=pltpu.CompilerParams(
            dimension_semantics=(pltpu.PARALLEL, pltpu.ARBITRARY),
            vmem_limit_bytes=vmem_limit),
    )(x, w, b, yb)

    # Combine the per-split partial sums (cheap scalar math in plain JAX).
    parts = out.reshape(num_splits, 8, cp)
    base_sum = jnp.sum(parts[:, 0, 0])
    n_corr = jnp.sum(parts[:, 1, 0])

    base_loss = base_sum / jnp.float32(B)               # reduction='batchmean'
    # dissonance = F.kl_div(h1_logsoftmax, h2_logsoftmax) with the pointwise
    # rule where(target > 0, target*(log target - input), 0); the target is a
    # log-softmax (<= 0 everywhere) so the term is identically zero.  The
    # support-nonempty gate (n_corr > 0) is kept for structural faithfulness;
    # lambda_c therefore has no effect on the returned value — exactly as in
    # the reference module.
    dissonance = jnp.where(n_corr > 0.0, 0.0, 0.0)
    return base_loss + jnp.float32(lambda_c) * dissonance


def _reference_loss(x, y, w1, b1, w2, b2, *, lambda_c, num_classes):
    """Pure-JAX reference of the same forward pass (bf16 heads, f32 accum),
    including the (mathematically zero) dissonance term of the spec."""
    xb = x.astype(jnp.bfloat16)
    l1 = jnp.dot(xb, w1.astype(jnp.bfloat16),
                 preferred_element_type=jnp.float32) + b1
    l2 = jnp.dot(xb, w2.astype(jnp.bfloat16),
                 preferred_element_type=jnp.float32) + b2
    ls1 = jax.nn.log_softmax(l1, axis=-1)
    ls2 = jax.nn.log_softmax(l2, axis=-1)
    B = y.shape[0]
    base = jnp.sum(-ls2[jnp.arange(B), y]) / B
    correct = jnp.argmax(ls1, axis=-1) == y
    n = jnp.sum(correct.astype(jnp.float32))
    tgt_pos = ls2 > 0.0
    diss_pw = jnp.where(tgt_pos,
                        ls2 * (jnp.log(jnp.where(tgt_pos, ls2, 1.0)) - ls1),
                        0.0)
    diss_pw = jnp.where(correct[:, None], diss_pw, 0.0)
    diss = jnp.where(n > 0.0,
                     jnp.sum(diss_pw) / jnp.maximum(n * num_classes, 1.0),
                     0.0)
    return base + lambda_c * diss


if __name__ == "__main__":
    B, D, C = 200, 64, 10          # batch not a tile multiple on purpose
    lambda_c = 0.5

    key = jax.random.PRNGKey(0)
    kx, ky, k1, k2, k3, k4 = jax.random.split(key, 6)

    x = jax.random.normal(kx, (B, D), dtype=jnp.float32)
    y = jax.random.randint(ky, (B,), 0, C, dtype=jnp.int32)

    # deterministic synthetic parameters for the two linear "models" h1, h2
    w1 = 0.1 * jax.random.normal(k1, (D, C), dtype=jnp.float32)
    b1 = 0.1 * jax.random.normal(k2, (C,), dtype=jnp.float32)
    w2 = 0.1 * jax.random.normal(k3, (D, C), dtype=jnp.float32)
    b2 = 0.1 * jax.random.normal(k4, (C,), dtype=jnp.float32)

    ref = _reference_loss(x, y, w1, b1, w2, b2,
                          lambda_c=lambda_c, num_classes=C)

    # v5e/v6e-style config: single split, ragged tail handled in-kernel.
    loss1 = strict_imitation_kl_loss(x, y, w1, b1, w2, b2,
                                     lambda_c=lambda_c, num_classes=C,
                                     tile_b=128, num_splits=1)
    loss1 = jax.block_until_ready(loss1)
    assert jnp.isfinite(loss1)
    assert jnp.allclose(loss1, ref, rtol=1e-3, atol=1e-5), (loss1, ref)

    # v7x-style config: two-way core split over the leading 'parallel' axis.
    loss2 = strict_imitation_kl_loss(x, y, w1, b1, w2, b2,
                                     lambda_c=lambda_c, num_classes=C,
                                     tile_b=64, num_splits=2)
    loss2 = jax.block_until_ready(loss2)
    assert jnp.isfinite(loss2)
    assert jnp.allclose(loss2, ref, rtol=1e-3, atol=1e-5), (loss2, ref)

    print("KERNEL_OK")
</pallas_src>

<mosaic_0001>
module attributes {stable_mosaic.version = 11 : i64} {
  func.func @_si_kl_kernel(%arg0: i32, %arg1: i32, %arg2: memref<128x64xf32, #tpu.memory_space<vmem>>, %arg3: memref<64x256xbf16, #tpu.memory_space<vmem>>, %arg4: memref<1x256xf32, #tpu.memory_space<vmem>>, %arg5: memref<128x1xi32, #tpu.memory_space<vmem>>, %arg6: memref<8x128xf32, #tpu.memory_space<vmem>>) attributes {dimension_semantics = [#tpu.dimension_semantics<parallel>, #tpu.dimension_semantics<arbitrary>], iteration_bounds = array<i64: 1, 2>, scalar_prefetch = 0 : i64, scratch_operands = 0 : i64, tpu.core_type = #tpu.core_type<tc>, window_params = [{transform_indices = @transform_0, window_bounds = array<i64: 128, 64>}, {pipeline_mode = #tpu.pipeline_mode<synchronous>, transform_indices = @transform_1, window_bounds = array<i64: 64, 256>}, {pipeline_mode = #tpu.pipeline_mode<synchronous>, transform_indices = @transform_2, window_bounds = array<i64: 1, 256>}, {transform_indices = @transform_3, window_bounds = array<i64: 128, 1>}, {transform_indices = @transform_4, window_bounds = array<i64: 8, 128>}]} {
    %c0_i32 = arith.constant 0 : i32
    %0 = arith.cmpi eq, %arg1, %c0_i32 : i32
    %1 = arith.extui %0 : i1 to i32
    %c0_i32_0 = arith.constant 0 : i32
    %2 = arith.cmpi ne, %1, %c0_i32_0 : i32
    scf.if %2 {
      %cst_29 = arith.constant 0.000000e+00 : f32
      %81 = vector.broadcast %cst_29 : f32 to vector<8x128xf32>
      %c0_30 = arith.constant 0 : index
      %c0_31 = arith.constant 0 : index
      %82 = vector.load %arg6[%c0_30, %c0_31] : memref<8x128xf32, #tpu.memory_space<vmem>>, vector<8x128xf32>
      tpu.vector_store %arg6[%c0_30, %c0_31], %81 {strides = array<i32>} : memref<8x128xf32, #tpu.memory_space<vmem>>, vector<8x128xf32>,
    } else {
    }
    %c0 = arith.constant 0 : index
    %c0_1 = arith.constant 0 : index
    %3 = vector.load %arg2[%c0, %c0_1] : memref<128x64xf32, #tpu.memory_space<vmem>>, vector<128x64xf32>
    %4 = arith.truncf %3 : vector<128x64xf32> to vector<128x64xbf16>
    %c0_2 = arith.constant 0 : index
    %c0_3 = arith.constant 0 : index
    %5 = vector.load %arg3[%c0_2, %c0_3] : memref<64x256xbf16, #tpu.memory_space<vmem>>, vector<64x256xbf16>
    %cst = arith.constant dense<0.000000e+00> : vector<128x256xf32>
    %6 = tpu.matmul %4, %5, %cst {dimension_numbers = #tpu.dot_dimension_numbers<[1], [0], [0], [1], [0, 0, 1, 1], [], []>} : vector<128x64xbf16>, vector<64x256xbf16>, vector<128x256xf32> -> vector<128x256xf32>
    %c0_4 = arith.constant 0 : index
    %c0_5 = arith.constant 0 : index
    %7 = vector.load %arg4[%c0_4, %c0_5] : memref<1x256xf32, #tpu.memory_space<vmem>>, vector<1x256xf32>
    %8 = vector.broadcast %7 : vector<1x256xf32> to vector<128x256xf32>
    %9 = arith.addf %6, %8 : vector<128x256xf32>
    %10 = vector.extract_strided_slice %9 {offsets = [0, 0], sizes = [128, 128], strides = [1, 1]} : vector<128x256xf32> to vector<128x128xf32>
    %11 = vector.extract_strided_slice %9 {offsets = [0, 128], sizes = [128, 128], strides = [1, 1]} : vector<128x256xf32> to vector<128x128xf32>
    %12 = tpu.iota {dimensions = array<i32: 1>} : vector<128x128xi32>
    %c0_6 = arith.constant 0 : index
    %c0_7 = arith.constant 0 : index
    %13 = vector.load %arg5[%c0_6, %c0_7] : memref<128x1xi32, #tpu.memory_space<vmem>>, vector<128x1xi32>
    %14 = vector.broadcast %13 : vector<128x1xi32> to vector<128x128xi32>
    %15 = arith.cmpi eq, %12, %14 : vector<128x128xi32>
    %c2_i32 = arith.constant 2 : i32
    %16 = arith.muli %arg0, %c2_i32 : i32
    %17 = arith.addi %16, %arg1 : i32
    %c128_i32 = arith.constant 128 : i32
    %18 = arith.muli %17, %c128_i32 : i32
    %19 = tpu.iota {dimensions = array<i32: 0>} : vector<128x1xi32>
    %20 = vector.broadcast %18 : i32 to vector<128x1xi32>
    %21 = arith.addi %20, %19 : vector<128x1xi32>
    %c200_i32 = arith.constant 200 : i32
    %22 = vector.broadcast %c200_i32 : i32 to vector<128x1xi32>
    %23 = arith.cmpi slt, %21, %22 : vector<128x1xi32>
    %cst_8 = arith.constant dense<0xFF800000> : vector<128xf32>
    %24 = vector.multi_reduction <maximumf>, %11, %cst_8 [1] : vector<128x128xf32> to vector<128xf32>
    %25 = vector.shape_cast %24 : vector<128xf32> to vector<128x1xf32>
    %26 = vector.broadcast %25 : vector<128x1xf32> to vector<128x128xf32>
    %27 = arith.subf %11, %26 : vector<128x128xf32>
    %28 = math.exp %27 : vector<128x128xf32>
    %cst_9 = arith.constant dense<0.000000e+00> : vector<128xf32>
    %29 = vector.multi_reduction <add>, %28, %cst_9 [1] : vector<128x128xf32> to vector<128xf32>
    %30 = vector.shape_cast %29 : vector<128xf32> to vector<128x1xf32>
    %31 = math.log %30 : vector<128x1xf32>
    %32 = arith.addf %25, %31 : vector<128x1xf32>
    %cst_10 = arith.constant 0.000000e+00 : f32
    %33 = vector.broadcast %cst_10 : f32 to vector<128x128xf32>
    %34 = arith.select %15, %11, %33 : vector<128x128xi1>, vector<128x128xf32>
    %cst_11 = arith.constant dense<0.000000e+00> : vector<128xf32>
    %35 = vector.multi_reduction <add>, %34, %cst_11 [1] : vector<128x128xf32> to vector<128xf32>
    %36 = vector.shape_cast %35 : vector<128xf32> to vector<128x1xf32>
    %37 = arith.subf %32, %36 : vector<128x1xf32>
    %cst_12 = arith.constant 0.000000e+00 : f32
    %38 = vector.broadcast %cst_12 : f32 to vector<128x1xf32>
    %39 = arith.select %23, %37, %38 : vector<128x1xi1>, vector<128x1xf32>
    %cst_13 = arith.constant dense<0xFF800000> : vector<128xf32>
    %40 = vector.multi_reduction <maximumf>, %10, %cst_13 [1] : vector<128x128xf32> to vector<128xf32>
    %41 = vector.shape_cast %40 : vector<128xf32> to vector<128x1xf32>
    %cst_14 = arith.constant 0.000000e+00 : f32
    %42 = vector.broadcast %cst_14 : f32 to vector<128x128xf32>
    %43 = arith.select %15, %10, %42 : vector<128x128xi1>, vector<128x128xf32>
    %cst_15 = arith.constant dense<0.000000e+00> : vector<128xf32>
    %44 = vector.multi_reduction <add>, %43, %cst_15 [1] : vector<128x128xf32> to vector<128xf32>
    %45 = vector.shape_cast %44 : vector<128xf32> to vector<128x1xf32>
    %46 = arith.cmpf oge, %45, %41 : vector<128x1xf32>
    %47 = arith.andi %46, %23 : vector<128x1xi1>
    %cst_16 = arith.constant 1.000000e+00 : f32
    %cst_17 = arith.constant 0.000000e+00 : f32
    %48 = vector.broadcast %cst_16 : f32 to vector<128x1xf32>
    %49 = vector.broadcast %cst_17 : f32 to vector<128x1xf32>
    %50 = arith.select %47, %48, %49 : vector<128x1xi1>, vector<128x1xf32>
    %51 = vector.shape_cast %39 : vector<128x1xf32> to vector<1x128x1xf32>
    %cst_18 = arith.constant dense<0.000000e+00> : vector<1xf32>
    %52 = vector.multi_reduction <add>, %51, %cst_18 [1, 2] : vector<1x128x1xf32> to vector<1xf32>
    %53 = vector.shape_cast %52 : vector<1xf32> to vector<1x1x1xf32>
    %54 = vector.extract %53[0, 0, 0] : f32 from vector<1x1x1xf32>
    %55 = vector.shape_cast %50 : vector<128x1xf32> to vector<1x128x1xf32>
    %cst_19 = arith.constant dense<0.000000e+00> : vector<1xf32>
    %56 = vector.multi_reduction <add>, %55, %cst_19 [1, 2] : vector<1x128x1xf32> to vector<1xf32>
    %57 = vector.shape_cast %56 : vector<1xf32> to vector<1x1x1xf32>
    %58 = vector.extract %57[0, 0, 0] : f32 from vector<1x1x1xf32>
    %59 = tpu.iota {dimensions = array<i32: 0>} : vector<8x128xi32>
    %60 = tpu.iota {dimensions = array<i32: 1>} : vector<8x128xi32>
    %c0_i32_20 = arith.constant 0 : i32
    %61 = vector.broadcast %c0_i32_20 : i32 to vector<8x128xi32>
    %62 = arith.cmpi eq, %59, %61 : vector<8x128xi32>
    %c0_i32_21 = arith.constant 0 : i32
    %63 = vector.broadcast %c0_i32_21 : i32 to vector<8x128xi32>
    %64 = arith.cmpi eq, %60, %63 : vector<8x128xi32>
    %65 = arith.andi %62, %64 : vector<8x128xi1>
    %cst_22 = arith.constant 0.000000e+00 : f32
    %66 = vector.broadcast %54 : f32 to vector<8x128xf32>
    %67 = vector.broadcast %cst_22 : f32 to vector<8x128xf32>
    %68 = arith.select %65, %66, %67 : vector<8x128xi1>, vector<8x128xf32>
    %c1_i32 = arith.constant 1 : i32
    %69 = vector.broadcast %c1_i32 : i32 to vector<8x128xi32>
    %70 = arith.cmpi eq, %59, %69 : vector<8x128xi32>
    %c0_i32_23 = arith.constant 0 : i32
    %71 = vector.broadcast %c0_i32_23 : i32 to vector<8x128xi32>
    %72 = arith.cmpi eq, %60, %71 : vector<8x128xi32>
    %73 = arith.andi %70, %72 : vector<8x128xi1>
    %cst_24 = arith.constant 0.000000e+00 : f32
    %74 = vector.broadcast %58 : f32 to vector<8x128xf32>
    %75 = vector.broadcast %cst_24 : f32 to vector<8x128xf32>
    %76 = arith.select %73, %74, %75 : vector<8x128xi1>, vector<8x128xf32>
    %77 = arith.addf %68, %76 : vector<8x128xf32>
    %c0_25 = arith.constant 0 : index
    %c0_26 = arith.constant 0 : index
    %78 = vector.load %arg6[%c0_25, %c0_26] : memref<8x128xf32, #tpu.memory_space<vmem>>, vector<8x128xf32>
    %79 = arith.addf %78, %77 : vector<8x128xf32>
    %c0_27 = arith.constant 0 : index
    %c0_28 = arith.constant 0 : index
    %80 = vector.load %arg6[%c0_27, %c0_28] : memref<8x128xf32, #tpu.memory_space<vmem>>, vector<8x128xf32>
    tpu.vector_store %arg6[%c0_27, %c0_28], %79 {strides = array<i32>} : memref<8x128xf32, #tpu.memory_space<vmem>>, vector<8x128xf32>,
    return
  }
  func.func @transform_0(%arg0: i32, %arg1: i32) -> (i32, i32) {
    %c2_i32 = arith.constant 2 : i32
    %0 = arith.muli %arg0, %c2_i32 : i32
    %1 = arith.addi %0, %arg1 : i32
    %c1_i32 = arith.constant 1 : i32
    %2 = arith.minsi %1, %c1_i32 : i32
    %c0_i32 = arith.constant 0 : i32
    %c0_i32_0 = arith.constant 0 : i32
    return %2, %c0_i32 : i32, i32
  }
  func.func @transform_1(%arg0: i32, %arg1: i32) -> (i32, i32) {
    %c0_i32 = arith.constant 0 : i32
    %c0_i32_0 = arith.constant 0 : i32
    %c0_i32_1 = arith.constant 0 : i32
    return %c0_i32, %c0_i32_0 : i32, i32
  }
  func.func @transform_2(%arg0: i32, %arg1: i32) -> (i32, i32) {
    %c0_i32 = arith.constant 0 : i32
    %c0_i32_0 = arith.constant 0 : i32
    %c0_i32_1 = arith.constant 0 : i32
    return %c0_i32, %c0_i32_0 : i32, i32
  }
  func.func @transform_3(%arg0: i32, %arg1: i32) -> (i32, i32) {
    %c2_i32 = arith.constant 2 : i32
    %0 = arith.muli %arg0, %c2_i32 : i32
    %1 = arith.addi %0, %arg1 : i32
    %c1_i32 = arith.constant 1 : i32
    %2 = arith.minsi %1, %c1_i32 : i32
    %c0_i32 = arith.constant 0 : i32
    %c0_i32_0 = arith.constant 0 : i32
    return %2, %c0_i32 : i32, i32
  }
  func.func @transform_4(%arg0: i32, %arg1: i32) -> (i32, i32) {
    %c0_i32 = arith.constant 0 : i32
    %c0_i32_0 = arith.constant 0 : i32
    return %arg0, %c0_i32 : i32, i32
  }
}

</mosaic_0001>

<bundles_post_ra>
// kernel: tpu_custom_call.1
= control target key start
LH: loop header
LB: loop body
LE: loop exit
PB: predicated region body
PF: predicated region fallthrough
CT: control target
= control target key end

     0   :  { %9 = vsyncpa [#allocation3], 0  ;;  %s1466_s15 = smov 0   ;;  %s1468_s16 = smov 0   ;;  %s2153_s0 = inlined_call_operand.vmem [shape: f32[200,64], index: 0, kind: input, shape index: {}]   ;;  %s2154_s1 = inlined_call_operand.vmem [shape: bf16[64,256], index: 1, kind: input, shape index: {}]   ;;  %s2155_s2 = inlined_call_operand.vmem [shape: f32[1,256], index: 2, kind: input, shape index: {}]   ;;  %s2156_s3 = inlined_call_operand.vmem [shape: s32[200,1], index: 3, kind: input, shape index: {}]   ;;  %s2157_s4 = inlined_call_operand.hbm [shape: f32[8,128], index: 4, kind: output, shape index: {}]  }
   0x1   :  { %s1470_s17 = smov 0  }
   0x2 LB: > { %s1198_s18 = sadd.s32 4294967295, %s1435_s17   ;;  %s24_s19 = sadd.s32 1, %s1431_s16  ;;  %s1435_s17 = sphi %s1470_s17, %s15_s17   ;;  %s1431_s16 = sphi %s1468_s16, %s2181_s16   ;;  %s1427_s15 = sphi %s1466_s15, %s2180_s15  }
   0x3   : > { %p25_p0 = scmp.ge.s32.totalorder %s24_s19, 2  ;;  %p1201_p1 = scmp.ge.s32.totalorder %s1435_s17, 1 }
   0x4   : > { %p235_p2 = scmp.lt.s32.totalorder %s1435_s17, 3 }
   0x5   : > { %s2183_s19 = smov (%p25_p0, %s24_s19), 0 }
   0x6   : > { %p236_p3 = pnand %p1201_p1, %p235_p2 }
   0x8   : > { %239 = sbr.rel (%p236_p3) target bundleno = 762 (0x2fa), region = 36 }
   0xd   : > { %p279_p4 = scmp.lt.s32.totalorder %s1427_s15, 1  ;;  %p1206_p6 = scmp.ne.s32.totalorder %s1427_s15, 0 }
   0xf   : > { %s280_s20 = scalar_select %p279_p4, %s1427_s15, 1 }
  0x11   : > { %s1202_s21 = sshll.u32 %s280_s20, 4 }
  0x12   : > { %p286_p5 = scmp.lt.s32.totalorder %s1202_s21, 24  ;;  %325 = sbr.rel (%p1206_p6) target bundleno = 25 (0x19), region = 40 }
  0x14   : > { %s2185_s21 = smov (!%p286_p5, %s1202_s21), 24 }
  0x15   : > { %s1203_s22 = sshll.u32 %s2185_s21, 3 }
  0x16   : > { %s1492_s25 = scalar_lea.vmem %s2153_s0, %s1203_s22  ;;  %s1497_s28 = scalar_lea.vmem %s2156_s3, %s1203_s22 }
  0x17   : > { %v1437_v0 = vmov 0.0  }
  0x18   : > { %326 = vst [vmem:[#allocation2] sm:$0xff] %v1437_v0 }
  0x19 PF: > { %v530_v1 = vld [vmem:[%s1497_s28] sm:$0xff]  ;;  %v1233_v2 = vld [vmem:[%s2154_s1 + $0x30] sm:$0xf]  ;;  %v1267_v3 = vld [vmem:[%s2154_s1 + $0x34] sm:$0xf0]  ;;  %v1438_v4 = vmov 0  }
  0x1a   : > { %1314 = vset.pattern.permute.xlu0 %v1438_v4  ;;  %v1234_v5 = vor.u32 %v1267_v3, %v1233_v2  ;;  %v1266_v6 = vld [vmem:[%s2154_s1 + $0x34] sm:$0xf]  ;;  %v1235_v7 = vld [vmem:[%s2154_s1 + $0x38] sm:$0xf0]  ;;  %v1225_v8 = vld [vmem:[%s2154_s1 + $0x20] sm:$0xf]  ;;  %1316 = vset.pattern.permute.xlu2 %v1438_v4  ;;  %v528_v3 = vlaneseq }
  0x1b   : > { %547 = vperm.xlu0 %1314, %v530_v1   ;;  %v1238_v9 = vor.u32 %v1266_v6, %v1235_v7  ;;  %v1265_v10 = vld [vmem:[%s2154_s1 + $0x24] sm:$0xf0]  ;;  %v1264_v11 = vld [vmem:[%s2154_s1 + $0x24] sm:$0xf]  ;;  %v1227_v12 = vld [vmem:[%s2154_s1 + $0x28] sm:$0xf0]  ;;  %1315 = vset.pattern.permute.xlu1 %v1438_v4 }
  0x1c   : > { %434 = vmatpush.bf16.msra.mxu0 %v1234_v5  ;;  %1268 = vmatpush.bf16.msra.mxu2 %v1234_v5  ;;  %v1226_v13 = vor.u32 %v1265_v10, %v1225_v8  ;;  %v1230_v14 = vor.u32 %v1264_v11, %v1227_v12  ;;  %v1217_v15 = vld [vmem:[%s2154_s1 + $0x10] sm:$0xf]  ;;  %v1263_v16 = vld [vmem:[%s2154_s1 + $0x14] sm:$0xf0]  ;;  %v1262_v17 = vld [vmem:[%s2154_s1 + $0x14] sm:$0xf] }
  0x1d   : > { %483 = vmatpush.bf16.msra.mxu1 %v1238_v9  ;;  %1272 = vmatpush.bf16.msra.mxu3 %v1238_v9  ;;  %v1219_v18 = vld [vmem:[%s2154_s1 + $0x18] sm:$0xf0]  ;;  %v531_v19 = vld [vmem:[%s1497_s28 + $0x8] sm:$0xff]  ;;  %v1218_v20 = vor.u32 %v1263_v16, %v1217_v15  ;;  %v534_v21 = vld [vmem:[%s1497_s28 + $0x20] sm:$0xff]  ;;  %vm405_vm0 = vcmask 523264   ;;  %v1602_v5 = vand.u32 127, %v528_v3 }
  0x1e   : > { %v1222_v22 = vor.u32 %v1262_v17, %v1219_v18  ;;  %v1209_v23 = vld [vmem:[%s2154_s1] sm:$0xf]  ;;  %v1261_v24 = vld [vmem:[%s2154_s1 + $0x4] sm:$0xf0]  ;;  %v532_v25 = vld [vmem:[%s1497_s28 + $0x10] sm:$0xff]  ;;  %559 = vperm.xlu2 %1316, %v534_v21   ;;  %s1440_s23 = smov [#allocation2]  }
  0x1f   : > { %v1260_v26 = vld [vmem:[%s2154_s1 + $0x4] sm:$0xf]  ;;  %v1211_v27 = vld [vmem:[%s2154_s1 + $0x8] sm:$0xf0]  ;;  %553 = vperm.xlu1 %1315, %v532_v25   ;;  %v1210_v28 = vor.u32 %v1261_v24, %v1209_v23  ;;  %v533_v36 = vld [vmem:[%s1497_s28 + $0x18] sm:$0xff]  ;;  %s1133_s24 = sshll.u32 %s1440_s23, 4  ;;  %s1134_s24 = int_to_ptr.vmem [resolvable:$true] %s1133_s24 }
  0x20   : > { %435 = vmatpush.bf16.msra.mxu0 %v1226_v13  ;;  %1269 = vmatpush.bf16.msra.mxu2 %v1226_v13  ;;  %v327_v29 = vld [vmem:[%s1492_s25] sm:$0xff]  ;;  %v328_v30 = vld [vmem:[%s1492_s25 + $0x8] sm:$0xff]  ;;  %v1214_v31 = vor.u32 %v1260_v26, %v1211_v27  ;;  %v536_v37 = vld [vmem:[%s1497_s28 + $0x30] sm:$0xff]  ;;  %s1135_s29 = sshll.u32 %s2157_s4, 4  ;;  %p1284_p7 = scmp.eq.s32.totalorder %s1198_s18, 1  ;;  %s1136_s29 = int_to_ptr.hbm [resolvable:$true] %s1135_s29 }
  0x21   : > { %484 = vmatpush.bf16.msra.mxu1 %v1230_v14  ;;  %1273 = vmatpush.bf16.msra.mxu3 %v1230_v14  ;;  %v335_v32 = vld [vmem:[%s1492_s25 + $0x40] sm:$0xff]  ;;  %v336_v33 = vld [vmem:[%s1492_s25 + $0x48] sm:$0xff]  ;;  %v343_v34 = vpack.c.bf16 %v328_v30, %v327_v29  ;;  %v537_v40 = vld [vmem:[%s1497_s28 + $0x38] sm:$0xff] }
  0x22   : > { %v535_v35 = vld [vmem:[%s1497_s28 + $0x28] sm:$0xff]  ;;  %v347_v38 = vpack.c.bf16 %v336_v33, %v335_v32  ;;  %v538_v39 = vld [vmem:[%s1497_s28 + $0x40] sm:$0xff]  ;;  %v329_v42 = vld [vmem:[%s1492_s25 + $0x10] sm:$0xff] }
  0x23   : > { %550 = vperm.xlu0 %1314, %v531_v19   ;;  %v539_v41 = vld [vmem:[%s1497_s28 + $0x48] sm:$0xff]  ;;  %v330_v43 = vld [vmem:[%s1492_s25 + $0x18] sm:$0xff]  ;;  %v337_v44 = vld [vmem:[%s1492_s25 + $0x50] sm:$0xff] }
  0x24   : > { %436 = vmatpush.bf16.msra.mxu0 %v1218_v20  ;;  %1270 = vmatpush.bf16.msra.mxu2 %v1218_v20  ;;  %v338_v45 = vld [vmem:[%s1492_s25 + $0x58] sm:$0xff]  ;;  %v344_v46 = vpack.c.bf16 %v330_v43, %v329_v42  ;;  %v540_v48 = vld [vmem:[%s1497_s28 + $0x50] sm:$0xff]  ;;  %v542_v49 = vld [vmem:[%s1497_s28 + $0x60] sm:$0xff] }
  0x25   : > { %485 = vmatpush.bf16.msra.mxu1 %v1222_v22  ;;  %1274 = vmatpush.bf16.msra.mxu3 %v1222_v22  ;;  %v541_v47 = vld [vmem:[%s1497_s28 + $0x58] sm:$0xff]  ;;  %v348_v50 = vpack.c.bf16 %v338_v45, %v337_v44  ;;  %v544_v51 = vld [vmem:[%s1497_s28 + $0x70] sm:$0xff]  ;;  %v543_v52 = vld [vmem:[%s1497_s28 + $0x68] sm:$0xff] }
  0x26   : > { %562 = vperm.xlu2 %1316, %v535_v35   ;;  %v545_v53 = vld [vmem:[%s1497_s28 + $0x78] sm:$0xff]  ;;  %v331_v54 = vld [vmem:[%s1492_s25 + $0x20] sm:$0xff]  ;;  %v332_v55 = vld [vmem:[%s1492_s25 + $0x28] sm:$0xff] }
  0x27   : > { %556 = vperm.xlu1 %1315, %v533_v36   ;;  %v339_v56 = vld [vmem:[%s1492_s25 + $0x60] sm:$0xff]  ;;  %v340_v57 = vld [vmem:[%s1492_s25 + $0x68] sm:$0xff]  ;;  %v345_v58 = vpack.c.bf16 %v332_v55, %v331_v54  ;;  %v333_v60 = vld [vmem:[%s1492_s25 + $0x30] sm:$0xff] }
  0x28   : > { %437 = vmatpush.bf16.msra.mxu0 %v1210_v28  ;;  %1271 = vmatpush.bf16.msra.mxu2 %v1210_v28  ;;  %v349_v59 = vpack.c.bf16 %v340_v57, %v339_v56  ;;  %v334_v61 = vld [vmem:[%s1492_s25 + $0x38] sm:$0xff]  ;;  %v341_v62 = vld [vmem:[%s1492_s25 + $0x70] sm:$0xff]  ;;  %v359_v4 = vld [vmem:[%s2155_s2] sm:$0x3] }
  0x29   : > { %486 = vmatpush.bf16.msra.mxu1 %v1214_v31  ;;  %1275 = vmatpush.bf16.msra.mxu3 %v1214_v31  ;;  %v342_v63 = vld [vmem:[%s1492_s25 + $0x78] sm:$0xff]  ;;  %v346_v0 = vpack.c.bf16 %v334_v61, %v333_v60  ;;  %v1604_v7 = vperm.slane %v359_v4, 0  ;;  %v1606_v8 = vperm.slane %v359_v4, 1  ;;  %s1255_s25 = sshll.u32 %s1427_s15, 7 }
  0x2a   : > { %v350_v1 = vpack.c.bf16 %v342_v63, %v341_v62 }
  0x2b   : > { %565 = vperm.xlu0 %1314, %v536_v37   ;;  %1239 = vmatmul.msk.bf16.vlgmr.msra.gmra.mxu0 %vm405_vm0, %v343_v34 }
  0x2c   : > { %1243 = vmatmul.msk.bf16.vlgmr.msra.gmra.mxu2 %vm405_vm0, %v347_v38  ;;  %1247 = vmatmul.msk.bf16.vlgmr.msra.gmra.mxu1 %vm405_vm0, %v343_v34 }
  0x2d   : > { %1251 = vmatmul.msk.bf16.vlgmr.msra.gmra.mxu3 %vm405_vm0, %v347_v38 }
  0x2e   : > { %571 = vperm.xlu2 %1316, %v538_v39  }
  0x2f   : > { %568 = vperm.xlu1 %1315, %v537_v40  }
  0x33   : > { %574 = vperm.xlu0 %1314, %v539_v41  }
  0x36   : > { %580 = vperm.xlu2 %1316, %v541_v47  }
  0x37   : > { %577 = vperm.xlu1 %1315, %v540_v48  }
  0x3b   : > { %583 = vperm.xlu0 %1314, %v542_v49   ;;  %1240 = vmatmul.msk.bf16.gmra.mxu0 %vm405_vm0, %v344_v46 }
  0x3c   : > { %1244 = vmatmul.msk.bf16.gmra.mxu2 %vm405_vm0, %v348_v50  ;;  %1248 = vmatmul.msk.bf16.gmra.mxu1 %vm405_vm0, %v344_v46 }
  0x3d   : > { %1252 = vmatmul.msk.bf16.gmra.mxu3 %vm405_vm0, %v348_v50 }
  0x3e   : > { %589 = vperm.xlu2 %1316, %v544_v51  }
  0x3f   : > { %586 = vperm.xlu1 %1315, %v543_v52  }
  0x43   : > { %592 = vperm.xlu0 %1314, %v545_v53  }
  0x4b   : > { %1241 = vmatmul.msk.bf16.gmra.mxu0 %vm405_vm0, %v345_v58 }
  0x4c   : > { %1245 = vmatmul.msk.bf16.gmra.mxu2 %vm405_vm0, %v349_v59  ;;  %1249 = vmatmul.msk.bf16.gmra.mxu1 %vm405_vm0, %v345_v58 }
  0x4d   : > { %1253 = vmatmul.msk.bf16.gmra.mxu3 %vm405_vm0, %v349_v59 }
  0x5b   : > { %1242 = vmatmul.msk.bf16.gmra.mxu0 %vm405_vm0, %v346_v0 }
  0x5c   : > { %1246 = vmatmul.msk.bf16.gmra.mxu2 %vm405_vm0, %v350_v1  ;;  %1250 = vmatmul.msk.bf16.gmra.mxu1 %vm405_vm0, %v346_v0 }
  0x5d   : > { %1254 = vmatmul.msk.bf16.gmra.mxu3 %vm405_vm0, %v350_v1 }
  0x78   : > { %v1596_v2 = vpop.permute.xlu2 %559 }
  0x79   : > { %vm598_vm4 = vcmp.eq.s32.totalorder %v1602_v5, %v1596_v2 }
  0x80   : > { %v1608_v9 = vpop.permute.xlu2 %562 }
  0x81   : > { %vm599_vm7 = vcmp.eq.s32.totalorder %v1602_v5, %v1608_v9 }
  0x88   : > { %v572_v20 = vpop.permute.xlu2 %571 }
  0x89   : > { %vm602_vm2 = vcmp.eq.s32.totalorder %v1602_v5, %v572_v20 }
  0x8d   : > { %v548_v6 = vpop.permute.xlu0 %547 }
  0x8e   : > { %vm594_vm1 = vcmp.eq.s32.totalorder %v1602_v5, %v548_v6 }
  0x90   : > { %v581_v9 = vpop.permute.xlu2 %580 }
  0x91   : > { %v554_v35 = vpop.permute.xlu1 %553  ;;  %vm605_vm14 = vcmp.eq.s32.totalorder %v1602_v5, %v581_v9 }
  0x92   : > { %vm596_vm8 = vcmp.eq.s32.totalorder %v1602_v5, %v554_v35 }
  0x95   : > { %v551_v16 = vpop.permute.xlu0 %550 }
  0x96   : > { %vm595_vm3 = vcmp.eq.s32.totalorder %v1602_v5, %v551_v16 }
  0x99   : > { %v557_v43 = vpop.permute.xlu1 %556 }
  0x9a   : > { %vm597_vm12 = vcmp.eq.s32.totalorder %v1602_v5, %v557_v43  ;;  %v1748_v43 = vpop.permute.xlu2 %589 }
  0x9d   : > { %v1628_v28 = vpop.permute.xlu0 %565 }
  0x9e   : > { %vm600_vm9 = vcmp.eq.s32.totalorder %v1602_v5, %v1628_v28 }
  0xa1   : > { %v1674_v57 = vpop.permute.xlu1 %568 }
  0xa2   : > { %vm601_vm11 = vcmp.eq.s32.totalorder %v1602_v5, %v1674_v57  ;;  %v1796_v57 = vstv %s1255_s25 }
  0xa5   : > { %v575_v38 = vpop.permute.xlu0 %574 }
  0xa6   : > { %vm603_vm5 = vcmp.eq.s32.totalorder %v1602_v5, %v575_v38 }
  0xa8   : > { %v439_v10 = vpop.f32.mrf.mxu0 }
  0xa9   : > { %v440_v11 = vadd.f32 %v439_v10, %v1604_v7  ;;  %v488_v12 = vpop.f32.mrf.mxu1  ;;  %v578_v4 = vpop.permute.xlu1 %577 }
  0xaa   : > { %v1613_v13 = vadd.f32 %v488_v12, %v1606_v8  ;;  %vm604_vm10 = vcmp.eq.s32.totalorder %v1602_v5, %v578_v4 }
  0xab   : > { %v935_v14 = vsel %vm594_vm1, %v440_v11, 0.0 }
  0xac   : > { %663 = vmax.xlane.f32.xlu1 %v1613_v13  ;;  %v823_v15 = vsel %vm594_vm1, %v1613_v13, 0.0  ;;  %951 = vadd.xlane.f32.xlu0 %v935_v14 }
  0xad   : > { %839 = vadd.xlane.f32.xlu2 %v823_v15  ;;  %v1648_v47 = vpop.permute.xlu0 %583 }
  0xae   : > { %vm606_vm6 = vcmp.eq.s32.totalorder %v1602_v5, %v1648_v47 }
  0xaf   : > { %v459_v17 = vpop.f32.mrf.mxu2 }
  0xb0   : > { %v508_v18 = vpop.f32.mrf.mxu3  ;;  %v441_v19 = vpop.f32.mrf.mxu0  ;;  %v460_v26 = vadd.f32 %v459_v17, %v1604_v7 }
  0xb1   : > { %v1618_v21 = vadd.f32 %v508_v18, %v1606_v8  ;;  %v490_v23 = vpop.f32.mrf.mxu1  ;;  %v442_v31 = vadd.f32 %v441_v19, %v1604_v7 }
  0xb2   : > { %v1624_v24 = vadd.f32 %v490_v23, %v1606_v8  ;;  %v943_v30 = vsel %vm602_vm2, %v460_v26, 0.0 }
  0xb3   : > { %v831_v22 = vsel %vm602_vm2, %v1618_v21, 0.0  ;;  %v936_v37 = vsel %vm595_vm3, %v442_v31, 0.0 }
  0xb4   : > { %903 = vmax.xlane.f32.xlu1 %v440_v11  ;;  %855 = vadd.xlane.f32.xlu0 %v831_v22  ;;  %v824_v29 = vsel %vm595_vm3, %v1624_v24, 0.0  ;;  %vm1031_vm3 = vcmask 7168  }
  0xb5   : > { %679 = vmax.xlane.f32.xlu2 %v1618_v21 }
  0xb7   : > { %v461_v25 = vpop.f32.mrf.mxu2 }
  0xb8   : > { %v444_v27 = vpop.f32.mrf.mxu0  ;;  %v510_v32 = vpop.f32.mrf.mxu3  ;;  %v462_v39 = vadd.f32 %v461_v25, %v1604_v7 }
  0xb9   : > { %v1633_v36 = vadd.f32 %v510_v32, %v1606_v8  ;;  %v493_v51 = vpop.f32.mrf.mxu1  ;;  %v445_v53 = vadd.f32 %v444_v27, %v1604_v7 }
  0xba   : > { %v944_v45 = vsel %vm603_vm5, %v462_v39, 0.0  ;;  %v1660_v54 = vadd.f32 %v493_v51, %v1606_v8 }
  0xbb   : > { %v832_v44 = vsel %vm603_vm5, %v1633_v36, 0.0  ;;  %v937_v0 = vsel %vm596_vm8, %v445_v53, 0.0 }
  0xbc   : > { %919 = vmax.xlane.f32.xlu1 %v460_v26  ;;  %841 = vadd.xlane.f32.xlu0 %v824_v29  ;;  %v825_v62 = vsel %vm596_vm8, %v1660_v54, 0.0 }
  0xbd   : > { %967 = vadd.xlane.f32.xlu2 %v943_v30 }
  0xbf   : > { %v464_v33 = vpop.f32.mrf.mxu2 }
  0xc0   : > { %v446_v34 = vpop.f32.mrf.mxu0  ;;  %v513_v59 = vpop.f32.mrf.mxu3  ;;  %v465_v1 = vadd.f32 %v464_v33, %v1604_v7 }
  0xc1   : > { %v1683_v61 = vadd.f32 %v513_v59, %v1606_v8  ;;  %v495_v15 = vpop.f32.mrf.mxu1  ;;  %v447_v16 = vadd.f32 %v446_v34, %v1604_v7 }
  0xc2   : > { %v945_v11 = vsel %vm604_vm10, %v465_v1, 0.0  ;;  %v1702_v17 = vadd.f32 %v495_v15, %v1606_v8 }
  0xc3   : > { %v833_v14 = vsel %vm604_vm10, %v1683_v61, 0.0  ;;  %v938_v19 = vsel %vm597_vm12, %v447_v16, 0.0 }
  0xc4   : > { %953 = vadd.xlane.f32.xlu1 %v936_v37  ;;  %681 = vmax.xlane.f32.xlu0 %v1633_v36  ;;  %v826_v18 = vsel %vm597_vm12, %v1702_v17, 0.0 }
  0xc5   : > { %665 = vmax.xlane.f32.xlu2 %v1624_v24 }
  0xc7   : > { %v1638_v40 = vpop.f32.mrf.mxu2 }
  0xc8   : > { %v449_v41 = vpop.f32.mrf.mxu0  ;;  %v515_v20 = vpop.f32.mrf.mxu3 }
  0xc9   : > { %v450_v42 = vadd.f32 %v449_v41, %v1604_v7  ;;  %v498_v22 = vpop.f32.mrf.mxu1  ;;  %v1715_v27 = vadd.f32 %v515_v20, %v1606_v8  ;;  %v1746_v41 = vpop.permute.xlu0 %592 }
  0xca   : > { %v1708_v23 = vadd.f32 %v498_v22, %v1606_v8 }
  0xcb   : > { %v939_v46 = vsel %vm598_vm4, %v450_v42, 0.0 }
  0xcc   : > { %857 = vadd.xlane.f32.xlu1 %v832_v44  ;;  %969 = vadd.xlane.f32.xlu0 %v944_v45  ;;  %v827_v32 = vsel %vm598_vm4, %v1708_v23, 0.0 }
  0xcd   : > { %905 = vmax.xlane.f32.xlu2 %v442_v31 }
  0xcf   : > { %v469_v48 = vpop.f32.mrf.mxu2 }
  0xd0   : > { %v1651_v49 = vadd.f32 %v469_v48, %v1604_v7  ;;  %v451_v50 = vpop.f32.mrf.mxu0  ;;  %v518_v25 = vpop.f32.mrf.mxu3 }
  0xd1   : > { %v452_v52 = vadd.f32 %v451_v50, %v1604_v7  ;;  %v1712_v26 = vadd.f32 %v518_v25, %v1606_v8  ;;  %v500_v29 = vpop.f32.mrf.mxu1 }
  0xd2   : > { %v1666_v55 = vsel %vm606_vm6, %v1651_v49, 0.0  ;;  %v1720_v30 = vadd.f32 %v500_v29, %v1606_v8  ;;  %v2158_v29 = vmov 0.0  }
  0xd3   : > { %v1671_v56 = vsel %vm599_vm7, %v452_v52, 0.0 }
  0xd4   : > { %907 = vmax.xlane.f32.xlu1 %v445_v53  ;;  %667 = vmax.xlane.f32.xlu0 %v1660_v54  ;;  %v828_v31 = vsel %vm599_vm7, %v1720_v30, 0.0  ;;  %v467_v53 = vadd.f32 %v1638_v40, %v1604_v7 }
  0xd5   : > { %921 = vmax.xlane.f32.xlu2 %v462_v39  ;;  %v1744_v39 = vpop.permute.xlu1 %586 }
  0xd8   : > { %v454_v58 = vpop.f32.mrf.mxu0  ;;  %v520_v33 = vpop.f32.mrf.mxu3 }
  0xd9   : > { %v1678_v60 = vadd.f32 %v454_v58, %v1604_v7  ;;  %v503_v34 = vpop.f32.mrf.mxu1  ;;  %v1731_v35 = vadd.f32 %v520_v33, %v1606_v8 }
  0xda   : > { %v1734_v37 = vadd.f32 %v503_v34, %v1606_v8 }
  0xdb   : > { %v941_v63 = vsel %vm600_vm9, %v1678_v60, 0.0 }
  0xdc   : > { %683 = vmax.xlane.f32.xlu1 %v1683_v61  ;;  %843 = vadd.xlane.f32.xlu0 %v825_v62  ;;  %v829_v2 = vsel %vm600_vm9, %v1734_v37, 0.0  ;;  %v946_v62 = vsel %vm605_vm14, %v467_v53, 0.0 }
  0xdd   : > { %955 = vadd.xlane.f32.xlu2 %v937_v0 }
  0xe0   : > { %v456_v6 = vpop.f32.mrf.mxu0  ;;  %v523_v38 = vpop.f32.mrf.mxu3 }
  0xe1   : > { %v457_v10 = vadd.f32 %v456_v6, %v1604_v7  ;;  %v1763_v51 = vadd.f32 %v523_v38, %v1606_v8  ;;  %v1794_v6 = vshrl.u32 %v528_v3, 7 }
  0xe3   : > { %v942_v12 = vsel %vm601_vm11, %v457_v10, 0.0  ;;  %v615_v15 = vadd.s32 8, %v1794_v6 }
  0xe4   : > { %971 = vadd.xlane.f32.xlu1 %v945_v11  ;;  %923 = vmax.xlane.f32.xlu0 %v465_v1  ;;  %v1803_v11 = vadd.s32 %v1796_v57, %v1794_v6 }
  0xe5   : > { %859 = vadd.xlane.f32.xlu2 %v833_v14  ;;  %v1816_v22 = vadd.s32 %v1796_v57, %v615_v15 }
  0xe6   : > { %vm647_vm0 = vcmp.lt.s32.totalorder %v1803_v11, 200 }
  0xe7   : > { %vm648_vm2 = vcmp.lt.s32.totalorder %v1816_v22, 200 }
  0xe8   : > { %v525_v28 = vpop.f32.mrf.mxu3 }
  0xe9   : > { %v1760_v50 = vadd.f32 %v525_v28, %v1606_v8 }
  0xec   : > { %845 = vadd.xlane.f32.xlu1 %v826_v18  ;;  %957 = vadd.xlane.f32.xlu0 %v938_v19 }
  0xed   : > { %669 = vmax.xlane.f32.xlu2 %v1702_v17 }
  0xf4   : > { %671 = vmax.xlane.f32.xlu1 %v1708_v23  ;;  %911 = vmax.xlane.f32.xlu0 %v450_v42  ;;  %v505_v42 = vpop.f32.mrf.mxu1 }
  0xf5   : > { %909 = vmax.xlane.f32.xlu2 %v447_v16  ;;  %v1751_v44 = vadd.f32 %v505_v42, %v1606_v8 }
  0xf7   : > { %v830_v40 = vsel %vm601_vm11, %v1751_v44, 0.0 }
  0xfc   : > { %959 = vadd.xlane.f32.xlu1 %v939_v46  ;;  %687 = vmax.xlane.f32.xlu0 %v1712_v26 }
  0xfd   : > { %685 = vmax.xlane.f32.xlu2 %v1715_v27 }
 0x104   : > { %913 = vmax.xlane.f32.xlu1 %v452_v52  ;;  %849 = vadd.xlane.f32.xlu0 %v828_v31 }
 0x105   : > { %847 = vadd.xlane.f32.xlu2 %v827_v32 }
 0x10c   : > { %689 = vmax.xlane.f32.xlu1 %v1731_v35  ;;  %675 = vmax.xlane.f32.xlu0 %v1734_v37 }
 0x10d   : > { %673 = vmax.xlane.f32.xlu2 %v1720_v30 }
 0x114   : > { %851 = vadd.xlane.f32.xlu1 %v829_v2  ;;  %963 = vadd.xlane.f32.xlu0 %v941_v63 }
 0x115   : > { %961 = vadd.xlane.f32.xlu2 %v1671_v56 }
 0x11c   : > { %677 = vmax.xlane.f32.xlu1 %v1751_v44  ;;  %917 = vmax.xlane.f32.xlu0 %v457_v10  ;;  %v834_v10 = vsel %vm605_vm14, %v1715_v27, 0.0 }
 0x11d   : > { %915 = vmax.xlane.f32.xlu2 %v1678_v60 }
 0x11f   : > { %v1755_v45 = vpop.xlane.xlu1 %663  ;;  %v952_v46 = vpop.xlane.xlu0 %951 }
 0x120   : > { %v1757_v48 = vpop.xlane.xlu2 %839  ;;  %v695_v52 = vsub.f32 %v1613_v13, %v1755_v45 }
 0x122   : > { %v711_v59 = vmul.f32 1.442695, %v695_v52 }
 0x124   : > { %965 = vadd.xlane.f32.xlu1 %v942_v12  ;;  %693 = vmax.xlane.f32.xlu0 %v1760_v50  ;;  %1317 = vpow2.f32 %v711_v59 }
 0x125   : > { %691 = vmax.xlane.f32.xlu2 %v1763_v51 }
 0x127   : > { %v904_v56 = vpop.xlane.xlu1 %903  ;;  %v1771_v58 = vpop.xlane.xlu0 %855 }
 0x128   : > { %vm983_vm13 = vcmp.ge.f32.partialorder %v952_v46, %v904_v56  ;;  %v1773_v60 = vpop.xlane.xlu2 %679  ;;  %v616_v46 = vadd.s32 16, %v1794_v6 }
 0x129   : > { %v703_v8 = vsub.f32 %v1618_v21, %v1773_v60  ;;  %vm999_vm1 = vmand %vm983_vm13, %vm647_vm0 }
 0x12a   : > { %v1318_v1 = vpop.eup %1317  ;;  %v1015_v31 = vsel %vm999_vm1, 1.0, %v2158_v29  ;;  %v1842_v59 = vadd.s32 %v1796_v57, %v616_v46 }
 0x12b   : > { %v727_v13 = vmul.f32 1.442695, %v703_v8  ;;  %v1072_v9 = vsel %vm1031_vm3, %v1015_v31, 0.0 }
 0x12c   : > { %973 = vadd.xlane.f32.xlu1 %v946_v62  ;;  %925 = vmax.xlane.f32.xlu0 %v467_v53  ;;  %vm649_vm8 = vcmp.lt.s32.totalorder %v1842_v59, 200 }
 0x12d   : > { %1319 = vpow2.f32 %v727_v13  ;;  %853 = vadd.xlane.f32.xlu2 %v830_v40 }
 0x12f   : > { %v1784_v63 = vpop.xlane.xlu1 %919  ;;  %v1786_v0 = vpop.xlane.xlu0 %841 }
 0x130   : > { %v1788_v21 = vpop.xlane.xlu2 %967 }
 0x131   : > { %vm991_vm15 = vcmp.ge.f32.partialorder %v1788_v21, %v1784_v63 }
 0x133   : > { %v1320_v4 = vpop.eup %1319 }
 0x134   : > { %743 = vadd.xlane.f32.xlu1 %v1318_v1  ;;  %759 = vadd.xlane.f32.xlu0 %v1320_v4 }
 0x135   : > { %861 = vadd.xlane.f32.xlu2 %v834_v10 }
 0x137   : > { %v954_v12 = vpop.xlane.xlu1 %953  ;;  %v1805_v14 = vpop.xlane.xlu0 %681 }
 0x138   : > { %v1808_v3 = vpop.xlane.xlu2 %665  ;;  %v704_v16 = vsub.f32 %v1633_v36, %v1805_v14 }
 0x139   : > { %v696_v18 = vsub.f32 %v1624_v24, %v1808_v3 }
 0x13a   : > { %v729_v19 = vmul.f32 1.442695, %v704_v16 }
 0x13b   : > { %v713_v20 = vmul.f32 1.442695, %v696_v18 }
 0x13c   : > { %1321 = vpow2.f32 %v729_v19 }
 0x13d   : > { %1323 = vpow2.f32 %v713_v20 }
 0x13f   : > { %v1821_v25 = vpop.xlane.xlu1 %857  ;;  %v1824_v36 = vpop.xlane.xlu0 %969 }
 0x140   : > { %v906_v24 = vpop.xlane.xlu2 %905 }
 0x141   : > { %vm984_vm4 = vcmp.ge.f32.partialorder %v954_v12, %v906_v24  ;;  %v617_v24 = vadd.s32 24, %v1794_v6 }
 0x142   : > { %v1322_v32 = vpop.eup %1321  ;;  %vm1000_vm5 = vmand %vm984_vm4, %vm648_vm2 }
 0x143   : > { %v1324_v33 = vpop.eup %1323  ;;  %v1016_v34 = vsel %vm1000_vm5, 1.0, %v2158_v29  ;;  %761 = vadd.xlane.f32.xlu1 %v1322_v32 }
 0x144   : > { %v1073_v2 = vsel %vm1031_vm3, %v1016_v34, 0.0  ;;  %745 = vadd.xlane.f32.xlu2 %v1324_v33  ;;  %v1871_v34 = vadd.s32 %v1796_v57, %v617_v24 }
 0x145   : > { %v1074_v38 = vadd.f32 %v1073_v2, %v1072_v9  ;;  %v618_v9 = vadd.s32 32, %v1794_v6 }
 0x146   : > { %vm650_vm12 = vcmp.lt.s32.totalorder %v1871_v34, 200 }
 0x147   : > { %v908_v42 = vpop.xlane.xlu1 %907  ;;  %v1832_v28 = vpop.xlane.xlu0 %667 }
 0x148   : > { %v1835_v52 = vpop.xlane.xlu2 %921  ;;  %v697_v53 = vsub.f32 %v1660_v54, %v1832_v28 }
 0x149   : > { %vm992_vm7 = vcmp.ge.f32.partialorder %v1824_v36, %v1835_v52 }
 0x14a   : > { %v715_v56 = vmul.f32 1.442695, %v697_v53 }
 0x14c   : > { %1325 = vpow2.f32 %v715_v56 }
 0x14f   : > { %v1844_v8 = vpop.xlane.xlu1 %683  ;;  %v1847_v13 = vpop.xlane.xlu0 %843 }
 0x150   : > { %v705_v62 = vsub.f32 %v1683_v61, %v1844_v8  ;;  %v956_v40 = vpop.xlane.xlu2 %955 }
 0x151   : > { %vm985_vm9 = vcmp.ge.f32.partialorder %v956_v40, %v908_v42 }
 0x152   : > { %v1326_v54 = vpop.eup %1325  ;;  %v731_v1 = vmul.f32 1.442695, %v705_v62  ;;  %vm1001_vm10 = vmand %vm985_vm9, %vm649_vm8 }
 0x153   : > { %v1017_v4 = vsel %vm1001_vm10, 1.0, %v2158_v29  ;;  %747 = vadd.xlane.f32.xlu0 %v1326_v54 }
 0x154   : > { %1327 = vpow2.f32 %v731_v1  ;;  %v1075_v10 = vsel %vm1031_vm3, %v1017_v4, 0.0 }
 0x155   : > { %v1076_v12 = vadd.f32 %v1075_v10, %v1074_v38 }
 0x157   : > { %v1855_v15 = vpop.xlane.xlu1 %971  ;;  %v1857_v16 = vpop.xlane.xlu0 %923 }
 0x158   : > { %v1859_v18 = vpop.xlane.xlu2 %859  ;;  %vm993_vm11 = vcmp.ge.f32.partialorder %v1855_v15, %v1857_v16 }
 0x159   : > { %2166 = vst [vmem:[#allocation5_spill] sm:$0xff] %v1859_v18 }
 0x15a   : > { %v1328_v61 = vpop.eup %1327 }
 0x15b   : > { %763 = vadd.xlane.f32.xlu2 %v1328_v61 }
 0x15f   : > { %v1863_v19 = vpop.xlane.xlu1 %845  ;;  %v958_v20 = vpop.xlane.xlu0 %957 }
 0x160   : > { %v1866_v31 = vpop.xlane.xlu2 %669 }
 0x161   : > { %v698_v32 = vsub.f32 %v1702_v17, %v1866_v31  ;;  %v1882_v17 = vadd.s32 %v1796_v57, %v618_v9 }
 0x163   : > { %v717_v33 = vmul.f32 1.442695, %v698_v32  ;;  %vm2164_vm1 = vcmp.lt.s32.totalorder %v1882_v17, 200 }
 0x165   : > { %1329 = vpow2.f32 %v717_v33 }
 0x167   : > { %v1874_v2 = vpop.xlane.xlu1 %671  ;;  %v912_v38 = vpop.xlane.xlu0 %911 }
 0x168   : > { %v699_v42 = vsub.f32 %v1708_v23, %v1874_v2  ;;  %v910_v46 = vpop.xlane.xlu2 %909 }
 0x169   : > { %vm986_vm13 = vcmp.ge.f32.partialorder %v958_v20, %v910_v46 }
 0x16a   : > { %v719_v53 = vmul.f32 1.442695, %v699_v42  ;;  %vm1002_vm14 = vmand %vm986_vm13, %vm650_vm12 }
 0x16b   : > { %v1330_v56 = vpop.eup %1329  ;;  %v1018_v62 = vsel %vm1002_vm14, 1.0, %v2158_v29 }
 0x16c   : > { %1331 = vpow2.f32 %v719_v53  ;;  %v1077_v40 = vsel %vm1031_vm3, %v1018_v62, 0.0  ;;  %749 = vadd.xlane.f32.xlu1 %v1330_v56 }
 0x16d   : > { %v1078_v54 = vadd.f32 %v1077_v40, %v1076_v12  ;;  %v619_v40 = vadd.s32 40, %v1794_v6 }
 0x16f   : > { %v960_v23 = vpop.xlane.xlu1 %959  ;;  %v1887_v1 = vpop.xlane.xlu0 %687 }
 0x170   : > { %2167 = vst [vmem:[#allocation6_spill] sm:$0xff] %v1887_v1  ;;  %vm987_vm4 = vcmp.ge.f32.partialorder %v960_v23, %v912_v38  ;;  %v1889_v4 = vpop.xlane.xlu2 %685  ;;  %v707_v10 = vsub.f32 %v1712_v26, %v1887_v1  ;;  %v624_v1 = vadd.s32 80, %v1794_v6 }
 0x171   : > { %vm1003_vm5 = vmand %vm987_vm4, %vm2164_vm1  ;;  %v706_v61 = vsub.f32 %v1715_v27, %v1889_v4 }
 0x172   : > { %v1332_v20 = vpop.eup %1331  ;;  %v1019_v12 = vsel %vm1003_vm5, 1.0, %v2158_v29  ;;  %v735_v24 = vmul.f32 1.442695, %v707_v10 }
 0x173   : > { %v1079_v32 = vsel %vm1031_vm3, %v1019_v12, 0.0  ;;  %v733_v33 = vmul.f32 1.442695, %v706_v61  ;;  %751 = vadd.xlane.f32.xlu2 %v1332_v20 }
 0x174   : > { %v1080_v9 = vadd.f32 %v1079_v32, %v1078_v54  ;;  %1333 = vpow2.f32 %v735_v24  ;;  %v1917_v32 = vadd.s32 %v1796_v57, %v619_v40 }
 0x175   : > { %1335 = vpow2.f32 %v733_v33 }
 0x176   : > { %vm2163_vm9 = vcmp.lt.s32.totalorder %v1917_v32, 200 }
 0x177   : > { %v914_v38 = vpop.xlane.xlu1 %913  ;;  %v1899_v42 = vpop.xlane.xlu0 %849 }
 0x178   : > { %v1901_v46 = vpop.xlane.xlu2 %847 }
 0x17a   : > { %v1334_v53 = vpop.eup %1333 }
 0x17b   : > { %v1336_v56 = vpop.eup %1335  ;;  %767 = vadd.xlane.f32.xlu1 %v1334_v53 }
 0x17c   : > { %765 = vadd.xlane.f32.xlu0 %v1336_v56  ;;  %v620_v56 = vadd.s32 48, %v1794_v6 }
 0x17f   : > { %v1903_v27 = vpop.xlane.xlu1 %689  ;;  %v1905_v62 = vpop.xlane.xlu0 %675 }
 0x180   : > { %2168 = vst [vmem:[#allocation7_spill] sm:$0xff] %v1903_v27  ;;  %v708_v54 = vsub.f32 %v1731_v35, %v1903_v27  ;;  %v1910_v23 = vpop.xlane.xlu2 %673  ;;  %v701_v10 = vsub.f32 %v1734_v37, %v1905_v62 }
 0x181   : > { %v700_v61 = vsub.f32 %v1720_v30, %v1910_v23 }
 0x182   : > { %v737_v20 = vmul.f32 1.442695, %v708_v54  ;;  %v723_v12 = vmul.f32 1.442695, %v701_v10  ;;  %v2169_v54 = vmov 0.0   ;;  %v1927_v10 = vadd.s32 %v1796_v57, %v620_v56 }
 0x183   : > { %v721_v24 = vmul.f32 1.442695, %v700_v61 }
 0x184   : > { %1337 = vpow2.f32 %v737_v20  ;;  %v622_v20 = vadd.s32 64, %v1794_v6  ;;  %vm2162_vm14 = vcmp.lt.s32.totalorder %v1927_v10, 200 }
 0x185   : > { %1339 = vpow2.f32 %v721_v24  ;;  %v623_v24 = vadd.s32 72, %v1794_v6 }
 0x186   : > { %1341 = vpow2.f32 %v723_v12  ;;  %v1937_v56 = vadd.s32 %v1796_v57, %v622_v20 }
 0x187   : > { %v1919_v33 = vpop.xlane.xlu1 %851  ;;  %v964_v53 = vpop.xlane.xlu0 %963  ;;  %v1943_v18 = vadd.s32 %v1796_v57, %v623_v24 }
 0x188   : > { %v962_v37 = vpop.xlane.xlu2 %961  ;;  %v471_v24 = vpop.f32.mrf.mxu2 }
 0x189   : > { %vm988_vm10 = vcmp.ge.f32.partialorder %v962_v37, %v914_v38  ;;  %v621_v37 = vadd.s32 56, %v1794_v6 }
 0x18a   : > { %v1338_v29 = vpop.eup %1337  ;;  %vm1004_vm13 = vmand %vm988_vm10, %vm2163_vm9  ;;  %vm655_vm10 = vcmp.lt.s32.totalorder %v1937_v56, 200  ;;  %v627_v56 = vadd.s32 104, %v1794_v6 }
 0x18b   : > { %v1340_v30 = vpop.eup %1339  ;;  %v1020_v40 = vsel %vm1004_vm13, 1.0, %v2169_v54  ;;  %769 = vadd.xlane.f32.xlu2 %v1338_v29  ;;  %vm656_vm13 = vcmp.lt.s32.totalorder %v1943_v18, 200 }
 0x18c   : > { %v1342_v61 = vpop.eup %1341  ;;  %v1081_v12 = vsel %vm1031_vm3, %v1020_v40, 0.0  ;;  %753 = vadd.xlane.f32.xlu0 %v1340_v30 }
 0x18d   : > { %v1082_v38 = vadd.f32 %v1081_v12, %v1080_v9  ;;  %755 = vadd.xlane.f32.xlu1 %v1342_v61  ;;  %v1948_v61 = vadd.s32 %v1796_v57, %v621_v37  ;;  %v1953_v12 = vadd.s32 %v1796_v57, %v624_v1  ;;  %v625_v37 = vadd.s32 88, %v1794_v6 }
 0x18f   : > { %v1933_v27 = vpop.xlane.xlu1 %677  ;;  %v918_v29 = vpop.xlane.xlu0 %917  ;;  %vm657_vm9 = vcmp.lt.s32.totalorder %v1953_v12, 200 }
 0x190   : > { %v702_v40 = vsub.f32 %v1751_v44, %v1933_v27  ;;  %v916_v30 = vpop.xlane.xlu2 %915 }
 0x191   : > { %vm989_vm4 = vcmp.ge.f32.partialorder %v964_v53, %v916_v30  ;;  %v472_v30 = vadd.f32 %v471_v24, %v1604_v7 }
 0x192   : > { %v725_v9 = vmul.f32 1.442695, %v702_v40  ;;  %vm1005_vm5 = vmand %vm989_vm4, %vm2162_vm14  ;;  %vm654_vm4 = vcmp.lt.s32.totalorder %v1948_v61, 200 }
 0x193   : > { %v1021_v20 = vsel %vm1005_vm5, 1.0, %v2169_v54  ;;  %vm1007_vm5 = vmand %vm991_vm15, %vm655_vm10 }
 0x194   : > { %1343 = vpow2.f32 %v725_v9  ;;  %v1083_v44 = vsel %vm1031_vm3, %v1021_v20, 0.0  ;;  %vm1973_vm14 = vmand %vm992_vm7, %vm656_vm13  ;;  %v1023_v36 = vsel %vm1007_vm5, 1.0, %v2169_v54  ;;  %vm607_vm7 = vcmp.eq.s32.totalorder %v1602_v5, %v1744_v39 }
 0x195   : > { %v1084_v53 = vadd.f32 %v1083_v44, %v1082_v38  ;;  %975 = vadd.xlane.f32.xlu1 %v1666_v55  ;;  %v1989_v44 = vadd.s32 %v1796_v57, %v625_v37  ;;  %v948_v37 = vsel %vm607_vm7, %v472_v30, 0.0 }
 0x197   : > { %v966_v1 = vpop.xlane.xlu1 %965  ;;  %v1965_v40 = vpop.xlane.xlu0 %693 }
 0x198   : > { %2170 = vst [vmem:[#allocation8_spill] sm:$0xff] %v1965_v40  ;;  %vm990_vm1 = vcmp.ge.f32.partialorder %v966_v1, %v918_v29  ;;  %v1978_v38 = vpop.xlane.xlu2 %691  ;;  %v710_v63 = vsub.f32 %v1760_v50, %v1965_v40  ;;  %v1024_v1 = vsel %vm1973_vm14, 1.0, %v2169_v54  ;;  %v1087_v40 = vsel %vm1031_vm3, %v1023_v36, 0.0 }
 0x199   : > { %vm1006_vm15 = vmand %vm990_vm1, %vm654_vm4  ;;  %v709_v21 = vsub.f32 %v1763_v51, %v1978_v38 }
 0x19a   : > { %v1344_v9 = vpop.eup %1343  ;;  %v1022_v52 = vsel %vm1006_vm15, 1.0, %v2169_v54  ;;  %v741_v20 = vmul.f32 1.442695, %v710_v63  ;;  %vm1009_vm1 = vmand %vm993_vm11, %vm657_vm9  ;;  %vm658_vm11 = vcmp.lt.s32.totalorder %v1989_v44, 200  ;;  %vm608_vm15 = vcmp.eq.s32.totalorder %v1602_v5, %v1748_v43 }
 0x19b   : > { %v1085_v29 = vsel %vm1031_vm3, %v1022_v52, 0.0  ;;  %v739_v24 = vmul.f32 1.442695, %v709_v21  ;;  %757 = vadd.xlane.f32.xlu2 %v1344_v9  ;;  %v1025_v15 = vsel %vm1009_vm1, 1.0, %v2169_v54  ;;  %v1089_v21 = vsel %vm1031_vm3, %v1024_v1, 0.0  ;;  %v474_v1 = vpop.f32.mrf.mxu2 }
 0x19c   : > { %v1086_v63 = vadd.f32 %v1085_v29, %v1084_v53  ;;  %1345 = vpow2.f32 %v741_v20  ;;  %v1091_v53 = vsel %vm1031_vm3, %v1025_v15, 0.0  ;;  %v475_v15 = vadd.f32 %v474_v1, %v1604_v7 }
 0x19d   : > { %1347 = vpow2.f32 %v739_v24  ;;  %977 = vadd.xlane.f32.xlu1 %v948_v37 }
 0x19e   : > { %v1088_v16 = vadd.f32 %v1087_v40, %v1086_v63  ;;  %v835_v40 = vsel %vm606_vm6, %v1712_v26, 0.0  ;;  %v949_v47 = vsel %vm608_vm15, %v475_v15, 0.0  ;;  %vm609_vm6 = vcmp.eq.s32.totalorder %v1602_v5, %v1746_v41 }
 0x19f   : > { %v974_v9 = vpop.xlane.xlu1 %973  ;;  %v926_v55 = vpop.xlane.xlu0 %925 }
 0x1a0   : > { %v1090_v52 = vadd.f32 %v1089_v21, %v1088_v16  ;;  %vm994_vm14 = vcmp.ge.f32.partialorder %v974_v9, %v926_v55  ;;  %v836_v16 = vsel %vm607_vm7, %v1731_v35, 0.0  ;;  %v837_v9 = vsel %vm608_vm15, %v1763_v51, 0.0 }
 0x1a1   : > { %vm1010_vm5 = vmand %vm994_vm14, %vm658_vm11  ;;  %v838_v35 = vsel %vm609_vm6, %v1760_v50, 0.0 }
 0x1a2   : > { %v1346_v20 = vpop.eup %1345  ;;  %v1092_v36 = vadd.f32 %v1091_v53, %v1090_v52  ;;  %v1026_v29 = vsel %vm1010_vm5, 1.0, %v2169_v54 }
 0x1a3   : > { %v1348_v24 = vpop.eup %1347  ;;  %v1093_v63 = vsel %vm1031_vm3, %v1026_v29, 0.0  ;;  %863 = vadd.xlane.f32.xlu2 %v835_v40  ;;  %v476_v26 = vpop.f32.mrf.mxu2 }
 0x1a4   : > { %v2018_v37 = vadd.f32 %v1093_v63, %v1092_v36  ;;  %771 = vadd.xlane.f32.xlu0 %v1348_v24  ;;  %v477_v21 = vadd.f32 %v476_v26, %v1604_v7 }
 0x1a5   : > { %773 = vadd.xlane.f32.xlu1 %v1346_v20 }
 0x1a6   : > { %v950_v39 = vsel %vm609_vm6, %v477_v21, 0.0 }
 0x1a7   : > { %v744_v43 = vpop.xlane.xlu1 %743  ;;  %v760_v7 = vpop.xlane.xlu0 %759 }
 0x1ab   : > { %865 = vadd.xlane.f32.xlu2 %v836_v16 }
 0x1ac   : > { %927 = vmax.xlane.f32.xlu0 %v1651_v49  ;;  %v2033_v49 = vpop.xlane.xlu2 %853 }
 0x1ad   : > { %979 = vadd.xlane.f32.xlu1 %v949_v47 }
 0x1b3   : > { %867 = vadd.xlane.f32.xlu2 %v837_v9 }
 0x1b4   : > { %929 = vmax.xlane.f32.xlu0 %v472_v30  ;;  %v2035_v55 = vpop.xlane.xlu2 %861 }
 0x1b5   : > { %981 = vadd.xlane.f32.xlu1 %v950_v39 }
 0x1b6   : > { %v762_v51 = vpop.xlane.xlu1 %761 }
 0x1bb   : > { %869 = vadd.xlane.f32.xlu2 %v838_v35 }
 0x1bc   : > { %931 = vmax.xlane.f32.xlu0 %v475_v15  ;;  %v746_v52 = vpop.xlane.xlu2 %745 }
 0x1bd   : > { %1349 = vlog2.f32 %v746_v52 }
 0x1be   : > { %1351 = vlog2.f32 %v744_v43 }
 0x1c3   : > { %v1350_v29 = vpop.eup %1349 }
 0x1c4   : > { %933 = vmax.xlane.f32.xlu0 %v477_v21  ;;  %v1352_v40 = vpop.eup %1351  ;;  %v778_v1 = vmul.f32 0.6931472, %v1350_v29 }
 0x1c5   : > { %v776_v16 = vmul.f32 0.6931472, %v1352_v40 }
 0x1c6   : > { %v748_v53 = vpop.xlane.xlu0 %747  ;;  %v808_v9 = vadd.f32 %v778_v1, %v1808_v3 }
 0x1c7   : > { %1353 = vlog2.f32 %v748_v53  ;;  %v807_v35 = vadd.f32 %v776_v16, %v1755_v45 }
 0x1cd   : > { %v1354_v24 = vpop.eup %1353 }
 0x1ce   : > { %v764_v20 = vpop.xlane.xlu2 %763  ;;  %v780_v47 = vmul.f32 0.6931472, %v1354_v24  ;;  %v871_v24 = vsub.f32 %v807_v35, %v1757_v48 }
 0x1d0   : > { %v809_v43 = vadd.f32 %v780_v47, %v1832_v28  ;;  %v887_v48 = vsel %vm647_vm0, %v871_v24, 0.0  ;;  %vm2173_vm0 = vcmp.lt.s32.totalorder %v1882_v17, 200 }
 0x1d1   : > { %v1032_v16 = vsel %vm1031_vm3, %v887_v48, 0.0  ;;  %v626_v48 = vadd.s32 96, %v1794_v6 }
 0x1d2   : > { %v873_v3 = vsub.f32 %v809_v43, %v1847_v13 }
 0x1d4   : > { %v889_v13 = vsel %vm649_vm8, %v873_v3, 0.0  ;;  %vm2175_vm8 = vcmp.lt.s32.totalorder %v1927_v10, 200 }
 0x1d5   : > { %v1035_v47 = vsel %vm1031_vm3, %v889_v13, 0.0 }
 0x1df   : > { %v750_v41 = vpop.xlane.xlu1 %749 }
 0x1e0   : > { %1355 = vlog2.f32 %v750_v41  ;;  %v872_v41 = vsub.f32 %v808_v9, %v1786_v0 }
 0x1e2   : > { %v888_v28 = vsel %vm648_vm2, %v872_v41, 0.0  ;;  %vm2174_vm2 = vcmp.lt.s32.totalorder %v1917_v32, 200 }
 0x1e6   : > { %v752_v36 = vpop.xlane.xlu2 %751  ;;  %v1356_v63 = vpop.eup %1355 }
 0x1e7   : > { %1357 = vlog2.f32 %v752_v36  ;;  %v782_v39 = vmul.f32 0.6931472, %v1356_v63 }
 0x1e9   : > { %v810_v36 = vadd.f32 %v782_v39, %v1866_v31 }
 0x1eb   : > { %v874_v0 = vsub.f32 %v810_v36, %v1863_v19 }
 0x1ed   : > { %v1358_v21 = vpop.eup %1357 }
 0x1ee   : > { %v768_v50 = vpop.xlane.xlu1 %767  ;;  %v784_v52 = vmul.f32 0.6931472, %v1358_v21 }
 0x1ef   : > { %v766_v30 = vpop.xlane.xlu0 %765 }
 0x1f0   : > { %v811_v1 = vadd.f32 %v784_v52, %v1874_v2 }
 0x1f2   : > { %v875_v2 = vsub.f32 %v811_v1, %v1901_v46 }
 0x1f4   : > { %v891_v46 = vsel %vm2173_vm0, %v875_v2, 0.0  ;;  %v2176_v2 = vld [vmem:[#allocation5_spill] sm:$0xff]  ;;  %vm1113_vm0 = vcmp.eq.s32.totalorder %v1602_v5, 0 }
 0x1f5   : > { %v1039_v52 = vsel %vm1031_vm3, %v891_v46, 0.0 }
 0x1fe   : > { %v770_v29 = vpop.xlane.xlu2 %769 }
 0x1ff   : > { %v754_v15 = vpop.xlane.xlu0 %753 }
 0x200   : > { %v756_v26 = vpop.xlane.xlu1 %755  ;;  %1359 = vlog2.f32 %v754_v15  ;;  %v1033_v15 = vsel %vm1031_vm3, %v888_v28, 0.0 }
 0x201   : > { %1361 = vlog2.f32 %v756_v26  ;;  %v1034_v26 = vadd.f32 %v1033_v15, %v1032_v16 }
 0x202   : > { %1363 = vlog2.f32 %v760_v7 }
 0x203   : > { %1365 = vlog2.f32 %v762_v51  ;;  %v1036_v9 = vadd.f32 %v1035_v47, %v1034_v26  ;;  %v2177_v47 = vld [vmem:[#allocation6_spill] sm:$0xff] }
 0x204   : > { %1367 = vlog2.f32 %v764_v20  ;;  %v890_v20 = vsel %vm650_vm12, %v874_v0, 0.0 }
 0x205   : > { %1369 = vlog2.f32 %v766_v30  ;;  %v1037_v34 = vsel %vm1031_vm3, %v890_v20, 0.0 }
 0x206   : > { %v1360_v53 = vpop.eup %1359  ;;  %v1038_v17 = vadd.f32 %v1037_v34, %v1036_v9 }
 0x207   : > { %v786_v40 = vmul.f32 0.6931472, %v1360_v53  ;;  %v1362_v63 = vpop.eup %1361 }
 0x208   : > { %v2045_v45 = vpop.xlane.xlu1 %975  ;;  %v1364_v7 = vpop.eup %1363  ;;  %v788_v51 = vmul.f32 0.6931472, %v1362_v63 }
 0x209   : > { %v812_v31 = vadd.f32 %v786_v40, %v1910_v23  ;;  %v1366_v22 = vpop.eup %1365  ;;  %v792_v11 = vmul.f32 0.6931472, %v1364_v7 }
 0x20a   : > { %v1368_v59 = vpop.eup %1367  ;;  %v813_v30 = vadd.f32 %v788_v51, %v1905_v62  ;;  %v794_v21 = vmul.f32 0.6931472, %v1366_v22 }
 0x20b   : > { %v876_v19 = vsub.f32 %v812_v31, %v1899_v42  ;;  %v1370_v39 = vpop.eup %1369  ;;  %v815_v35 = vadd.f32 %v792_v11, %v1773_v60  ;;  %v796_v43 = vmul.f32 0.6931472, %v1368_v59 }
 0x20c   : > { %v877_v41 = vsub.f32 %v813_v30, %v1919_v33  ;;  %v816_v36 = vadd.f32 %v794_v21, %v1805_v14  ;;  %v798_v24 = vmul.f32 0.6931472, %v1370_v39  ;;  %v628_v30 = vadd.s32 112, %v1794_v6 }
 0x20d   : > { %v892_v42 = vsel %vm2174_vm2, %v876_v19, 0.0  ;;  %v879_v60 = vsub.f32 %v815_v35, %v1771_v58  ;;  %v817_v1 = vadd.f32 %v796_v43, %v1844_v8  ;;  %v644_v39 = vadd.s32 %v1796_v57, %v627_v56  ;;  %v2178_v43 = vld [vmem:[#allocation7_spill] sm:$0xff] }
 0x20e   : > { %v758_v23 = vpop.xlane.xlu2 %757  ;;  %v1041_v40 = vsel %vm1031_vm3, %v892_v42, 0.0  ;;  %v893_v0 = vsel %vm2175_vm8, %v877_v41, 0.0  ;;  %v880_v14 = vsub.f32 %v816_v36, %v1821_v25  ;;  %v818_v7 = vadd.f32 %v798_v24, %v1889_v4 }
 0x20f   : > { %1371 = vlog2.f32 %v758_v23  ;;  %v1043_v8 = vsel %vm1031_vm3, %v893_v0, 0.0  ;;  %v895_v10 = vsel %vm655_vm10, %v879_v60, 0.0  ;;  %v881_v51 = vsub.f32 %v817_v1, %v2176_v2 }
 0x210   : > { %1373 = vlog2.f32 %v768_v50  ;;  %v2070_v53 = vpop.xlane.xlu1 %977  ;;  %v1040_v50 = vadd.f32 %v1039_v52, %v1038_v17  ;;  %v896_v25 = vsel %vm656_vm13, %v880_v14, 0.0  ;;  %v882_v20 = vsub.f32 %v818_v7, %v2035_v55 }
 0x211   : > { %1375 = vlog2.f32 %v770_v29  ;;  %v643_v23 = vadd.s32 %v1796_v57, %v626_v48  ;;  %v1047_v11 = vsel %vm1031_vm3, %v895_v10, 0.0  ;;  %v897_v18 = vsel %vm657_vm9, %v881_v51, 0.0 }
 0x212   : > { %v1042_v33 = vadd.f32 %v1041_v40, %v1040_v50  ;;  %v1049_v55 = vsel %vm1031_vm3, %v896_v25, 0.0  ;;  %v898_v9 = vsel %vm658_vm11, %v882_v20, 0.0  ;;  %v1051_v35 = vsel %vm1031_vm3, %v897_v18, 0.0 }
 0x213   : > { %vm659_vm12 = vcmp.lt.s32.totalorder %v643_v23, 200  ;;  %v645_v17 = vadd.s32 %v1796_v57, %v628_v30  ;;  %vm660_vm9 = vcmp.lt.s32.totalorder %v644_v39, 200  ;;  %vm1117_vm2 = vcmp.eq.s32.totalorder %v1794_v6, 1 }
 0x214   : > { %v1044_v15 = vadd.f32 %v1043_v8, %v1042_v33 }
 0x215   : > { %v1372_v62 = vpop.eup %1371  ;;  %vm661_vm10 = vcmp.lt.s32.totalorder %v645_v17, 200  ;;  %v1122_v17 = vld [vmem:[#allocation2] sm:$0xff] }
 0x216   : > { %v790_v32 = vmul.f32 0.6931472, %v1372_v62  ;;  %v864_v3 = vpop.xlane.xlu2 %863  ;;  %v1374_v28 = vpop.eup %1373  ;;  %v1053_v62 = vsel %vm1031_vm3, %v898_v9, 0.0 }
 0x217   : > { %v772_v63 = vpop.xlane.xlu0 %771  ;;  %v800_v58 = vmul.f32 0.6931472, %v1374_v28  ;;  %v1376_v13 = vpop.eup %1375 }
 0x218   : > { %v814_v31 = vadd.f32 %v790_v32, %v1933_v27  ;;  %1377 = vlog2.f32 %v772_v63  ;;  %v802_v61 = vmul.f32 0.6931472, %v1376_v13  ;;  %v629_v32 = vadd.s32 120, %v1794_v6 }
 0x219   : > { %v819_v59 = vadd.f32 %v800_v58, %v2177_v47 }
 0x21a   : > { %v878_v29 = vsub.f32 %v814_v31, %v2033_v49  ;;  %v774_v49 = vpop.xlane.xlu1 %773  ;;  %v820_v12 = vadd.f32 %v802_v61, %v2178_v43  ;;  %v646_v33 = vadd.s32 %v1796_v57, %v629_v32 }
 0x21b   : > { %1379 = vlog2.f32 %v774_v49  ;;  %v883_v21 = vsub.f32 %v819_v59, %v864_v3 }
 0x21c   : > { %v894_v27 = vsel %vm654_vm4, %v878_v29, 0.0  ;;  %v2179_v29 = vld [vmem:[#allocation8_spill] sm:$0xff]  ;;  %vm662_vm1 = vcmp.lt.s32.totalorder %v646_v33, 200 }
 0x21d   : > { %v1045_v4 = vsel %vm1031_vm3, %v894_v27, 0.0  ;;  %v899_v41 = vsel %vm659_vm12, %v883_v21, 0.0 }
 0x21e   : > { %v1378_v22 = vpop.eup %1377  ;;  %v1046_v19 = vadd.f32 %v1045_v4, %v1044_v15  ;;  %v866_v16 = vpop.xlane.xlu2 %865  ;;  %v1055_v1 = vsel %vm1031_vm3, %v899_v41, 0.0 }
 0x21f   : > { %v928_v26 = vpop.xlane.xlu0 %927  ;;  %v804_v34 = vmul.f32 0.6931472, %v1378_v22  ;;  %v884_v36 = vsub.f32 %v820_v12, %v866_v16 }
 0x220   : > { %v1048_v46 = vadd.f32 %v1047_v11, %v1046_v19  ;;  %vm995_vm13 = vcmp.ge.f32.partialorder %v2045_v45, %v928_v26 }
 0x221   : > { %v821_v40 = vadd.f32 %v804_v34, %v1978_v38  ;;  %v1380_v44 = vpop.eup %1379  ;;  %v900_v0 = vsel %vm660_vm9, %v884_v36, 0.0  ;;  %vm1011_vm7 = vmand %vm995_vm13, %vm659_vm12 }
 0x222   : > { %v1050_v42 = vadd.f32 %v1049_v55, %v1048_v46  ;;  %v806_v28 = vmul.f32 0.6931472, %v1380_v44  ;;  %v1057_v31 = vsel %vm1031_vm3, %v900_v0, 0.0  ;;  %v980_v7 = vpop.xlane.xlu1 %979  ;;  %v1027_v13 = vsel %vm1011_vm7, 1.0, %v2169_v54  ;;  %vm1118_vm12 = vmand %vm1117_vm2, %vm1113_vm0 }
 0x223   : > { %v1095_v27 = vsel %vm1031_vm3, %v1027_v13, 0.0 }
 0x224   : > { %v1052_v52 = vadd.f32 %v1051_v35, %v1050_v42  ;;  %v822_v48 = vadd.f32 %v806_v28, %v2179_v29  ;;  %v1096_v49 = vadd.f32 %v1095_v27, %v2018_v37 }
 0x226   : > { %v1054_v50 = vadd.f32 %v1053_v62, %v1052_v52  ;;  %v868_v24 = vpop.xlane.xlu2 %867 }
 0x227   : > { %v885_v3 = vsub.f32 %v821_v40, %v868_v24  ;;  %v930_v60 = vpop.xlane.xlu0 %929 }
 0x228   : > { %v1056_v63 = vadd.f32 %v1055_v1, %v1054_v50  ;;  %vm996_vm4 = vcmp.ge.f32.partialorder %v2070_v53, %v930_v60 }
 0x229   : > { %v901_v38 = vsel %vm661_vm10, %v885_v3, 0.0  ;;  %vm1012_vm11 = vmand %vm996_vm4, %vm660_vm9 }
 0x22a   : > { %v1058_v14 = vadd.f32 %v1057_v31, %v1056_v63  ;;  %v1059_v58 = vsel %vm1031_vm3, %v901_v38, 0.0  ;;  %v1028_v2 = vsel %vm1012_vm11, 1.0, %v2169_v54  ;;  %v982_v22 = vpop.xlane.xlu1 %981 }
 0x22b   : > { %v1097_v4 = vsel %vm1031_vm3, %v1028_v2, 0.0 }
 0x22c   : > { %v1060_v53 = vadd.f32 %v1059_v58, %v1058_v14  ;;  %v1098_v23 = vadd.f32 %v1097_v4, %v1096_v49 }
 0x22e   : > { %v870_v8 = vpop.xlane.xlu2 %869 }
 0x22f   : > { %v886_v45 = vsub.f32 %v822_v48, %v870_v8  ;;  %v932_v57 = vpop.xlane.xlu0 %931 }
 0x230   : > { %vm997_vm14 = vcmp.ge.f32.partialorder %v980_v7, %v932_v57 }
 0x231   : > { %v902_v10 = vsel %vm662_vm1, %v886_v45, 0.0  ;;  %vm1013_vm5 = vmand %vm997_vm14, %vm661_vm10 }
 0x232   : > { %v1061_v51 = vsel %vm1031_vm3, %v902_v10, 0.0  ;;  %v1029_v25 = vsel %vm1013_vm5, 1.0, %v2169_v54 }
 0x233   : > { %v1062_v15 = vadd.f32 %v1061_v51, %v1060_v53  ;;  %v1099_v20 = vsel %vm1031_vm3, %v1029_v25, 0.0 }
 0x234   : > { %v1100_v16 = vadd.f32 %v1099_v20, %v1098_v23 }
 0x235   : > { %1063 = vadd.xlane.f32.xlu2 %v1062_v15 }
 0x237   : > { %v934_v19 = vpop.xlane.xlu0 %933 }
 0x238   : > { %vm998_vm15 = vcmp.ge.f32.partialorder %v982_v22, %v934_v19 }
 0x239   : > { %vm1014_vm6 = vmand %vm998_vm15, %vm662_vm1 }
 0x23a   : > { %v1030_v56 = vsel %vm1014_vm6, 1.0, %v2169_v54 }
 0x23b   : > { %v1101_v11 = vsel %vm1031_vm3, %v1030_v56, 0.0  ;;  %vm1112_vm3 = vcmp.eq.s32.totalorder %v1794_v6, 0 }
 0x23c   : > { %v1102_v61 = vadd.f32 %v1101_v11, %v1100_v16  ;;  %vm1114_vm8 = vmand %vm1112_vm3, %vm1113_vm0 }
 0x23e   : > { %1103 = vadd.xlane.f32.xlu0 %v1102_v61 }
 0x2a8   : > { %v1064_v47 = vpop.xlane.xlu2 %1063 }
 0x2a9   : > { %v1065_v59 = vrot.slane %v1064_v47, 4 }
 0x2ab   : > { %v1066_v26 = vadd.f32 %v1065_v59, %v1064_v47 }
 0x2ad   : > { %v1067_v18 = vrot.slane %v1066_v26, 2 }
 0x2af   : > { %v1068_v37 = vadd.f32 %v1067_v18, %v1066_v26 }
 0x2b1   : > { %v1104_v46 = vpop.xlane.xlu0 %1103  ;;  %v1069_v30 = vrot.slane %v1068_v37, 1 }
 0x2b2   : > { %v1105_v55 = vrot.slane %v1104_v46, 4 }
 0x2b3   : > { %v1070_v21 = vadd.f32 %v1069_v30, %v1068_v37 }
 0x2b4   : > { %v1106_v34 = vadd.f32 %v1105_v55, %v1104_v46 }
 0x2b5   : > { %1276 = vpush %v1070_v21 }
 0x2b6   : > { %v1107_v9 = vrot.slane %v1106_v34, 2 }
 0x2b8   : > { %v1108_v42 = vadd.f32 %v1107_v9, %v1106_v34 }
 0x2ba   : > { %v1109_v39 = vrot.slane %v1108_v42, 1 }
 0x2bc   : > { %v1110_v54 = vadd.f32 %v1109_v39, %v1108_v42 }
 0x2be   : > { %1278 = vpush %v1110_v54 }
 0x2e6   : > { %s1277_s15 = spop %1276 }
 0x2e7   : > { %v1115_v35 = vstv %s1277_s15 }
 0x2e8   : > { %v1116_v12 = vsel %vm1114_vm8, %v1115_v35, 0.0 }
 0x2ef   : > { %s1279_s22 = spop %1278 }
 0x2f0   : > { %v1119_v43 = vstv %s1279_s22 }
 0x2f1   : > { %v1120_v52 = vsel %vm1118_vm12, %v1119_v43, 0.0 }
 0x2f2   : > { %v1121_v41 = vadd.f32 %v1120_v52, %v1116_v12 }
 0x2f4   : > { %v1123_v5 = vadd.f32 %v1122_v17, %v1121_v41 }
 0x2f6   : > { %1124 = vst [vmem:[#allocation2] sm:$0xff] %v1123_v5 }
 0x2f7   : > { %1281 = dma.vmem_to_hbm [thread:$0]  (%p1284_p7), %s1134_s24, 128, %s1136_s29, [#allocation3]  }
 0x2f8   : > { %1422 = dma.done.wait (%p1284_p7), [#allocation3], 128  }
 0x2f9   : > { %1424 = vsyncadd (%p1284_p7), [#allocation3], 4294967168 }
 0x2fa PF: > { %s15_s17 = sadd.s32 1, %s1435_s17   ;;  %s2180_s15 = smov %s1431_s16 }
 0x2fb   : > { %p12_p8 = scmp.ge.s32.totalorder %s15_s17, 4   ;;  %s2181_s16 = smov %s2183_s19 }
 0x2fd   :  { %14 = sbr.rel (!%p12_p8) target bundleno = 2 (0x2), region = 71 }
 0x302   :  { %1149 = vsyncpa [#allocation3], 1 }
 0x303   :  { %1151 = vsyncpa [#allocation3 + $0x1], 1 }

</bundles_post_ra>
